<compile_context>
chip_gen: v6e
topology: v6e:2x2x1
jax: 0.10.0
libtpu: 0.0.40
codegen_flags: <defaults>
</compile_context>

<pallas_src>
import jax
import jax.numpy as jnp
from jax.experimental import pallas as pl
from jax.experimental.pallas import tpu as pltpu

_VMEM_LIMIT = 48 * 1024 * 1024          # < 64 MiB (v7x physical), < 128 MiB (v5e/v6e)
_CONV_TILE_BUDGET = 16 * 1024 * 1024    # bytes of VMEM spent on conv lane tiles


# ----------------------------------------------------------------------------
# helpers
# ----------------------------------------------------------------------------
def _round_up(x, m):
    return (x + m - 1) // m * m


def _pick_tile(total, cap, quantum):
    """Largest divisor of `total` that is a multiple of `quantum` and <= cap.
    Falls back to the full extent (always a legal block) if none exists."""
    if total <= cap:
        return total
    t = (cap // quantum) * quantum
    while t >= quantum:
        if total % t == 0:
            return t
        t -= quantum
    # TODO(synk): at full PET resolution pad M to a multiple of 128 so a
    # budget-sized tile always exists instead of falling back to full extent.
    return total


def _conv_lane_tile(M, Kpad, Cout, budget=_CONV_TILE_BUDGET):
    """Lane tile for the conv GEMM from a VMEM byte budget:
    cols (bf16, double-buffered) + out (bf16, double-buffered) + f32 scratch."""
    per_lane = 2 * 2 * Kpad + 2 * 2 * Cout + 4 * Cout
    cap = max(128, budget // per_lane // 128 * 128)
    # Prefer >= 2 blocks on the 'parallel' lane axis (v7x has 2 TensorCores).
    if M >= 256:
        cap = min(cap, max(128, (M // 2) // 128 * 128))
    return _pick_tile(M, cap, 128)


# ----------------------------------------------------------------------------
# Pallas kernels
# ----------------------------------------------------------------------------
def _conv_pool_kernel(w_ref, cols_ref, b_ref, o_ref, acc_ref):
    """relu( maxpool_{8 window offsets}( W @ cols + b ) ) for one lane tile.

    grid = (lane_tiles [parallel], 8 pool-window offsets [arbitrary]).
    The f32 accumulator holds the running max over the window axis; bias and
    ReLU commute with the max (bias constant over the window, ReLU monotone),
    so they are applied once in the epilogue — all in f32 (v5e-friendly)."""
    wdx = pl.program_id(1)
    val = jnp.dot(w_ref[...], cols_ref[0], preferred_element_type=jnp.float32)

    @pl.when(wdx == 0)
    def _():
        acc_ref[...] = val

    @pl.when(wdx > 0)
    def _():
        acc_ref[...] = jnp.maximum(acc_ref[...], val)

    @pl.when(wdx == pl.num_programs(1) - 1)
    def _():
        o_ref[...] = jnp.maximum(acc_ref[...] + b_ref[...], 0.0).astype(o_ref.dtype)


def _fc_kernel(x_ref, w_ref, b_ref, o_ref):
    # single-block FC: no accumulator scratch / pl.when path (demo-size fc_in)
    acc = jnp.dot(x_ref[...], w_ref[...], preferred_element_type=jnp.float32)
    o_ref[...] = jnp.maximum(acc + b_ref[...], 0.0)


def _fc_kernel_ktiled(x_ref, w_ref, b_ref, o_ref, acc_ref):
    @pl.when(pl.program_id(0) == 0)
    def _():
        acc_ref[...] = jnp.zeros_like(acc_ref)

    acc_ref[...] += jnp.dot(x_ref[...], w_ref[...],
                            preferred_element_type=jnp.float32)

    @pl.when(pl.program_id(0) == pl.num_programs(0) - 1)
    def _():
        o_ref[...] = jnp.maximum(acc_ref[...] + b_ref[...], 0.0)


# ----------------------------------------------------------------------------
# wrappers
# ----------------------------------------------------------------------------
def conv_gemm_relu_pool(w, cols, b, Cout, M):
    """w: (Cout, Kpad) bf16; cols: (8, Kpad, M) bf16 (pool-window-major);
    b: (Cout, 1) f32.  Returns relu(maxpool(w @ cols + b)) as (Cout, M) bf16."""
    _, Kpad = w.shape
    tn = _conv_lane_tile(M, Kpad, Cout)
    grid = (M // tn, 8)
    return pl.pallas_call(
        _conv_pool_kernel,
        out_shape=jax.ShapeDtypeStruct((Cout, M), jnp.bfloat16),
        grid=grid,
        in_specs=[
            pl.BlockSpec((Cout, Kpad), lambda j, wdx: (0, 0)),    # weight, resident
            pl.BlockSpec((1, Kpad, tn), lambda j, wdx: (wdx, 0, j)),  # cols tile
            pl.BlockSpec((Cout, 1), lambda j, wdx: (0, 0)),       # bias, resident
        ],
        out_specs=pl.BlockSpec((Cout, tn), lambda j, wdx: (0, j)),
        scratch_shapes=[pltpu.VMEM((Cout, tn), jnp.float32)],
        compiler_params=pltpu.CompilerParams(
            dimension_semantics=("parallel", "arbitrary"),
            vmem_limit_bytes=_VMEM_LIMIT),
    )(w, cols, b)


def fc_relu(x, w_t, b, tk_max=8192):
    """x: (B, Kpad) bf16, w_t: (Kpad, N) bf16 (pre-transposed), b: (1, N) f32.
    Returns relu(x @ w_t + b) f32.  Single block at demo size; K-tiled with an
    f32 accumulator at real PET fc_in."""
    B, Kpad = x.shape
    Kpad2, Nout = w_t.shape
    assert Kpad == Kpad2 and Kpad % 128 == 0 and Nout % 128 == 0
    if Kpad <= tk_max:
        return pl.pallas_call(
            _fc_kernel,
            out_shape=jax.ShapeDtypeStruct((B, Nout), jnp.float32),
            grid=(1,),
            in_specs=[
                pl.BlockSpec((B, Kpad), lambda i: (0, 0)),
                pl.BlockSpec((Kpad, Nout), lambda i: (0, 0)),
                pl.BlockSpec((1, Nout), lambda i: (0, 0)),
            ],
            out_specs=pl.BlockSpec((B, Nout), lambda i: (0, 0)),
            compiler_params=pltpu.CompilerParams(vmem_limit_bytes=_VMEM_LIMIT),
        )(x, w_t, b)
    tk = _pick_tile(Kpad, tk_max, 128)
    return pl.pallas_call(
        _fc_kernel_ktiled,
        out_shape=jax.ShapeDtypeStruct((B, Nout), jnp.float32),
        grid=(Kpad // tk,),
        in_specs=[
            pl.BlockSpec((B, tk), lambda kk: (0, kk)),
            pl.BlockSpec((tk, Nout), lambda kk: (kk, 0)),
            pl.BlockSpec((1, Nout), lambda kk: (0, 0)),
        ],
        out_specs=pl.BlockSpec((B, Nout), lambda kk: (0, 0)),
        scratch_shapes=[pltpu.VMEM((B, Nout), jnp.float32)],
        compiler_params=pltpu.CompilerParams(
            dimension_semantics=("arbitrary",),
            vmem_limit_bytes=_VMEM_LIMIT),
    )(x, w_t, b)


# ----------------------------------------------------------------------------
# JAX glue: pool-window-major im2col + parameter preparation
# ----------------------------------------------------------------------------
def im2col_pool_window_major(x, k):
    """x: (Cin, N, D, H, W).  Returns cols (8, Cin*k^3, N*L), L = Dp*Hp*Wp.

    Axis 0 is the 2x2x2 pool-window offset (hoisted outermost), so the fused
    conv kernel can max-reduce over it as a grid axis.  Row order is
    (cin, kd, kh, kw) matching the PyTorch Conv3d weight layout; column order
    is (n, dp, hp, wp).  Odd conv-output edges are cropped, which is exactly
    MaxPool3d's floor semantics.
    TODO(synk): fuse this gather into the conv kernel (direct conv) at full
    PET resolution — it is the remaining ~125x HBM blow-up (review item 1)."""
    C, N, D, H, W = x.shape
    Do, Ho, Wo = D - k + 1, H - k + 1, W - k + 1
    Dp, Hp, Wp = Do // 2, Ho // 2, Wo // 2      # floor => crop odd edge
    patches = []
    for dz in range(k):
        for dy in range(k):
            for dx in range(k):
                patches.append(
                    x[:, :, dz:dz + 2 * Dp, dy:dy + 2 * Hp, dx:dx + 2 * Wp])
    p = jnp.stack(patches, axis=1)              # (C, k^3, N, 2Dp, 2Hp, 2Wp)
    p = p.reshape(C, k ** 3, N, Dp, 2, Hp, 2, Wp, 2)
    p = p.transpose(4, 6, 8, 0, 1, 2, 3, 5, 7)  # (2,2,2, C, k^3, N, Dp, Hp, Wp)
    cols = p.reshape(8, C * k ** 3, N * Dp * Hp * Wp)
    return cols, (N, Dp, Hp, Wp)


def conv_relu_pool(x, w, b, k):
    """x: (Cin, N, D, H, W) bf16; w: (Cout, Kpad) bf16; b: (Cout, 1) f32.
    Valid stride-1 conv (kernel k) + ReLU + MaxPool3d(2), fused in one kernel.
    Returns (Cout, N, Dp, Hp, Wp) bf16 (channels-major, ready for next layer)."""
    Cin = x.shape[0]
    Cout, Kpad = w.shape
    cols, (N, Dp, Hp, Wp) = im2col_pool_window_major(x, k)
    K = Cin * k ** 3
    if Kpad > K:                                # 128-align the K axis
        cols = jnp.pad(cols, ((0, 0), (0, Kpad - K), (0, 0)))
    M = N * Dp * Hp * Wp
    y = conv_gemm_relu_pool(w, cols, b, Cout, M)  # (Cout, M) bf16, pooled
    return y.reshape(Cout, N, Dp, Hp, Wp)


def init_params(key, fc_in):
    """Parameters in PyTorch layout: Conv3d (Cout, Cin, kD, kH, kW), Linear (out, in)."""
    k1, k2, k3, k4, k5, k6 = jax.random.split(key, 6)
    return {
        "w1": 0.05 * jax.random.normal(k1, (16, 1, 5, 5, 5), jnp.float32),
        "b1": 0.01 * jax.random.normal(k2, (16,), jnp.float32),
        "w2": 0.02 * jax.random.normal(k3, (32, 16, 5, 5, 5), jnp.float32),
        "b2": 0.01 * jax.random.normal(k4, (32,), jnp.float32),
        "wfc": 0.02 * jax.random.normal(k5, (128, fc_in), jnp.float32),
        "bfc": 0.01 * jax.random.normal(k6, (128,), jnp.float32),
    }


def prepare_params(p):
    """One-time conversion to kernel layout: GEMM-shaped bf16 weights with the
    K axis zero-padded to a multiple of 128, fc weight pre-transposed (no .T
    per forward), biases as f32 column/row vectors."""
    def conv_w(w):
        Cout = w.shape[0]
        K = w.shape[1] * w.shape[2] * w.shape[3] * w.shape[4]
        Kpad = _round_up(K, 128)
        wm = jnp.pad(w.reshape(Cout, K), ((0, 0), (0, Kpad - K)))
        return wm.astype(jnp.bfloat16)

    fc_out, fc_in = p["wfc"].shape
    fc_in_pad = _round_up(fc_in, 128)
    wfc_t = jnp.pad(p["wfc"].T, ((0, fc_in_pad - fc_in), (0, 0)))
    return {
        "w1": conv_w(p["w1"]), "b1": p["b1"].reshape(-1, 1).astype(jnp.float32),
        "w2": conv_w(p["w2"]), "b2": p["b2"].reshape(-1, 1).astype(jnp.float32),
        "wfc_t": wfc_t.astype(jnp.bfloat16),
        "bfc": p["bfc"].reshape(1, -1).astype(jnp.float32),
    }


def pet_cnn_forward(kp, x):
    """x: (N, 1, D, H, W) float32, NCDHW like the PyTorch module."""
    # channels-major internal layout (C, N, D, H, W); free since Cin == 1
    a = jnp.transpose(x, (1, 0, 2, 3, 4)).astype(jnp.bfloat16)
    # x = self.pool(F.relu(self.conv1(x)))   -- fused conv+ReLU+pool kernel
    a = conv_relu_pool(a, kp["w1"], kp["b1"], k=5)
    # x = self.pool(F.relu(self.conv2(x)))   -- fused conv+ReLU+pool kernel
    a = conv_relu_pool(a, kp["w2"], kp["b2"], k=5)
    # x = x.view(-1, C*D*H*W)   (torch flatten order per sample: C, D, H, W)
    N = a.shape[1]
    flat = jnp.transpose(a, (1, 0, 2, 3, 4)).reshape(N, -1)   # tiny pooled act.
    fc_in, fc_in_pad = flat.shape[1], kp["wfc_t"].shape[0]
    if fc_in_pad > fc_in:
        flat = jnp.pad(flat, ((0, 0), (0, fc_in_pad - fc_in)))
    # x = F.relu(self.fc1(x))
    return fc_relu(flat, kp["wfc_t"], kp["bfc"])


if __name__ == "__main__":
    key = jax.random.PRNGKey(0)
    kx, kparams = jax.random.split(key)

    # small demo volume: batch=2, 1 channel, 20x20x20 (NCDHW)
    x = jax.random.normal(kx, (2, 1, 20, 20, 20), jnp.float32)

    # 20 -conv5-> 16 -pool-> 8 -conv5-> 4 -pool-> 2  =>  fc_in = 32*2*2*2
    fc_in = 32 * 2 * 2 * 2
    params = prepare_params(init_params(kparams, fc_in))

    out = pet_cnn_forward(params, x)
    out = jax.block_until_ready(out)
    assert out.shape == (2, 128), out.shape
    assert bool(jnp.all(out >= 0.0))  # ReLU output
    print("KERNEL_OK")
</pallas_src>

<mosaic_0001>
module attributes {stable_mosaic.version = 11 : i64} {
  func.func @_conv_pool_kernel(%arg0: i32, %arg1: i32, %arg2: memref<16x128xbf16, #tpu.memory_space<vmem>>, %arg3: memref<1x128x512xbf16, #tpu.memory_space<vmem>>, %arg4: memref<16x1xf32, #tpu.memory_space<vmem>>, %arg5: memref<16x512xbf16, #tpu.memory_space<vmem>>, %arg6: memref<16x512xf32, #tpu.memory_space<vmem>>) attributes {dimension_semantics = [#tpu.dimension_semantics<parallel>, #tpu.dimension_semantics<arbitrary>], iteration_bounds = array<i64: 2, 8>, scalar_prefetch = 0 : i64, scratch_operands = 1 : i64, tpu.core_type = #tpu.core_type<tc>, window_params = [{pipeline_mode = #tpu.pipeline_mode<synchronous>, transform_indices = @transform_0, window_bounds = array<i64: 16, 128>}, {transform_indices = @transform_1, window_bounds = array<i64: 1, 128, 512>}, {pipeline_mode = #tpu.pipeline_mode<synchronous>, transform_indices = @transform_2, window_bounds = array<i64: 16, 1>}, {transform_indices = @transform_3, window_bounds = array<i64: 16, 512>}]} {
    %c0 = arith.constant 0 : index
    %c0_0 = arith.constant 0 : index
    %0 = vector.load %arg2[%c0, %c0_0] : memref<16x128xbf16, #tpu.memory_space<vmem>>, vector<16x128xbf16>
    %c0_1 = arith.constant 0 : index
    %c0_2 = arith.constant 0 : index
    %c0_3 = arith.constant 0 : index
    %1 = vector.load %arg3[%c0_1, %c0_2, %c0_3] : memref<1x128x512xbf16, #tpu.memory_space<vmem>>, vector<1x128x512xbf16>
    %2 = vector.shape_cast %1 : vector<1x128x512xbf16> to vector<128x512xbf16>
    %cst = arith.constant dense<0.000000e+00> : vector<16x512xf32>
    %3 = tpu.matmul %0, %2, %cst {dimension_numbers = #tpu.dot_dimension_numbers<[1], [0], [0], [1], [0, 0, 1, 1], [], []>} : vector<16x128xbf16>, vector<128x512xbf16>, vector<16x512xf32> -> vector<16x512xf32>
    %c0_i32 = arith.constant 0 : i32
    %4 = arith.cmpi eq, %arg1, %c0_i32 : i32
    %5 = arith.extui %4 : i1 to i32
    %c0_i32_4 = arith.constant 0 : i32
    %6 = arith.cmpi ne, %5, %c0_i32_4 : i32
    scf.if %6 {
      %c0_8 = arith.constant 0 : index
      %c0_9 = arith.constant 0 : index
      %13 = vector.load %arg6[%c0_8, %c0_9] : memref<16x512xf32, #tpu.memory_space<vmem>>, vector<16x512xf32>
      tpu.vector_store %arg6[%c0_8, %c0_9], %3 {strides = array<i32>} : memref<16x512xf32, #tpu.memory_space<vmem>>, vector<16x512xf32>,
    } else {
    }
    %c0_i32_5 = arith.constant 0 : i32
    %7 = arith.cmpi sgt, %arg1, %c0_i32_5 : i32
    %8 = arith.extui %7 : i1 to i32
    %c0_i32_6 = arith.constant 0 : i32
    %9 = arith.cmpi ne, %8, %c0_i32_6 : i32
    scf.if %9 {
      %c0_8 = arith.constant 0 : index
      %c0_9 = arith.constant 0 : index
      %13 = vector.load %arg6[%c0_8, %c0_9] : memref<16x512xf32, #tpu.memory_space<vmem>>, vector<16x512xf32>
      %14 = arith.maximumf %13, %3 : vector<16x512xf32>
      %c0_10 = arith.constant 0 : index
      %c0_11 = arith.constant 0 : index
      %15 = vector.load %arg6[%c0_10, %c0_11] : memref<16x512xf32, #tpu.memory_space<vmem>>, vector<16x512xf32>
      tpu.vector_store %arg6[%c0_10, %c0_11], %14 {strides = array<i32>} : memref<16x512xf32, #tpu.memory_space<vmem>>, vector<16x512xf32>,
    } else {
    }
    %c7_i32 = arith.constant 7 : i32
    %10 = arith.cmpi eq, %arg1, %c7_i32 : i32
    %11 = arith.extui %10 : i1 to i32
    %c0_i32_7 = arith.constant 0 : i32
    %12 = arith.cmpi ne, %11, %c0_i32_7 : i32
    scf.if %12 {
      %c0_8 = arith.constant 0 : index
      %c0_9 = arith.constant 0 : index
      %13 = vector.load %arg6[%c0_8, %c0_9] : memref<16x512xf32, #tpu.memory_space<vmem>>, vector<16x512xf32>
      %c0_10 = arith.constant 0 : index
      %c0_11 = arith.constant 0 : index
      %14 = vector.load %arg4[%c0_10, %c0_11] : memref<16x1xf32, #tpu.memory_space<vmem>>, vector<16x1xf32>
      %15 = vector.broadcast %14 : vector<16x1xf32> to vector<16x512xf32>
      %16 = arith.addf %13, %15 : vector<16x512xf32>
      %cst_12 = arith.constant 0.000000e+00 : f32
      %17 = vector.broadcast %cst_12 : f32 to vector<16x512xf32>
      %18 = arith.maximumf %16, %17 : vector<16x512xf32>
      %19 = arith.truncf %18 : vector<16x512xf32> to vector<16x512xbf16>
      %c0_13 = arith.constant 0 : index
      %c0_14 = arith.constant 0 : index
      %20 = vector.load %arg5[%c0_13, %c0_14] : memref<16x512xbf16, #tpu.memory_space<vmem>>, vector<16x512xbf16>
      tpu.vector_store %arg5[%c0_13, %c0_14], %19 {strides = array<i32>} : memref<16x512xbf16, #tpu.memory_space<vmem>>, vector<16x512xbf16>,
    } else {
    }
    return
  }
  func.func @transform_0(%arg0: i32, %arg1: i32) -> (i32, i32) {
    %c0_i32 = arith.constant 0 : i32
    %c0_i32_0 = arith.constant 0 : i32
    %c0_i32_1 = arith.constant 0 : i32
    return %c0_i32, %c0_i32_0 : i32, i32
  }
  func.func @transform_1(%arg0: i32, %arg1: i32) -> (i32, i32, i32) {
    %c0_i32 = arith.constant 0 : i32
    %c0_i32_0 = arith.constant 0 : i32
    return %arg1, %c0_i32, %arg0 : i32, i32, i32
  }
  func.func @transform_2(%arg0: i32, %arg1: i32) -> (i32, i32) {
    %c0_i32 = arith.constant 0 : i32
    %c0_i32_0 = arith.constant 0 : i32
    %c0_i32_1 = arith.constant 0 : i32
    return %c0_i32, %c0_i32_0 : i32, i32
  }
  func.func @transform_3(%arg0: i32, %arg1: i32) -> (i32, i32) {
    %c0_i32 = arith.constant 0 : i32
    %c0_i32_0 = arith.constant 0 : i32
    return %c0_i32, %arg0 : i32, i32
  }
}

</mosaic_0001>

<bundles_post_ra>
// kernel: tpu_custom_call.1
= control target key start
LH: loop header
LB: loop body
LE: loop exit
PB: predicated region body
PF: predicated region fallthrough
CT: control target
= control target key end

     0   :  { %s1468_s0 = inlined_call_operand.hbm [shape: bf16[16,128], index: 0, kind: input, shape index: {}]   ;;  %s1469_s1 = inlined_call_operand.hbm [shape: bf16[8,128,1024], index: 1, kind: input, shape index: {}]   ;;  %s1470_s2 = inlined_call_operand.vmem [shape: f32[16,1], index: 2, kind: input, shape index: {}]   ;;  %s1471_s3 = inlined_call_operand.hbm [shape: bf16[16,1024], index: 3, kind: output, shape index: {}]  }
   0x1   :  { %1482 = sst [smem:[#allocation17_spill]] %s1468_s0 }
   0x2   :  { %1483 = sst [smem:[#allocation18_spill]] %s1471_s3 }
   0x3   :  { %8 = vsyncpa [#allocation4], 0 }
   0x4   :  { %9 = vsyncpa [#allocation7], 0 }
   0x5   :  { %11 = vsyncpa [#allocation7 + $0x1], 0 }
   0x6   :  { %12 = vsyncpa [#allocation5], 0 }
   0x7   :  { %14 = vsyncpa [#allocation5 + $0x1], 0  ;;  %s1179_s12 = smov 0   ;;  %s1181_s13 = smov 0  }
   0x8   :  { %s1183_s14 = smov 0   ;;  %s1185_s15 = smov 0  }
   0x9   :  { %s1187_s16 = smov 0   ;;  %s1189_s17 = smov 0  }
   0xa   :  { %s1191_s18 = smov 0   ;;  %s1193_s19 = smov 0  }
   0xb   :  { %s1195_s20 = smov 0   ;;  %s1197_s21 = smov 0  }
   0xc   :  { %s1199_s22 = smov 0  }
   0xd LB: > { %1484 = sst [smem:[#allocation12_spill]] %s1104_s12  ;;  %s730_s23 = sadd.s32 4294967295, %s1144_s22   ;;  %s1144_s22 = sphi %s1199_s22, %s20_s22   ;;  %s1140_s21 = sphi %s1197_s21, %s1518_s21   ;;  %s1136_s20 = sphi %s1195_s20, %s1510_s20   ;;  %s1132_s19 = sphi %s1193_s19, %s1517_s19   ;;  %s1128_s18 = sphi %s1191_s18, %s1509_s18   ;;  %s1124_s17 = sphi %s1189_s17, %s1516_s17   ;;  %s1120_s16 = sphi %s1187_s16, %s1515_s16   ;;  %s1116_s15 = sphi %s1185_s15, %s1514_s15   ;;  %s1112_s14 = sphi %s1183_s14, %s1513_s14   ;;  %s1108_s13 = sphi %s1181_s13, %s1512_s13   ;;  %s1104_s12 = sphi %s1179_s12, %s1511_s12  }
   0xe   : > { %1485 = sst [smem:[#allocation13_spill]] %s1136_s20  ;;  %s731_s24 = sadd.s32 4294967294, %s1144_s22  }
   0xf   : > { %1486 = sst [smem:[#allocation14_spill]] %s1144_s22  ;;  %p69_p0 = scmp.ne.s32.totalorder %s1124_s17, %s1120_s16 }
  0x10   : > { %p70_p1 = scmp.eq.s32.totalorder %s1144_s22, 0  ;;  %p75_p2 = scmp.ne.s32.totalorder %s1120_s16, %s1116_s15 }
  0x11   : > { %p1239_p3 = scmp.eq.s32.totalorder %s730_s23, 0  ;;  %p119_p5 = scmp.ne.s32.totalorder %s1112_s14, %s1108_s13 }
  0x12   : > { %p1244_p4 = por %p70_p1, %p69_p0  ;;  %p120_p7 = scmp.eq.s32.totalorder %s730_s23, 15 }
  0x13   : > { %p1252_p6 = por %p1239_p3, %p75_p2  ;;  %p125_p8 = scmp.ne.s32.totalorder %s1108_s13, %s1104_s12 }
  0x14   : > { %p126_p9 = scmp.eq.s32.totalorder %s731_s24, 15  ;;  %p1258_p10 = por %p120_p7, %p119_p5 }
  0x15   : > { %s1489_s29 = scalar_select %p1252_p6, 1, 0 }
  0x16   : > { %s1490_s30 = scalar_select %p1258_p10, 1, 0 }
  0x17   : > { %p732_p11 = scmp.ge.s32.totalorder %s1144_s22, 1  ;;  %p1263_p12 = por %p126_p9, %p125_p8 }
  0x18   : > { %p133_p13 = scmp.lt.s32.totalorder %s1144_s22, 17  ;;  %s1146_s6 = smov [#allocation3]  }
  0x19   : > { %s1491_s4 = scalar_select %p1263_p12, 1, 0 }
  0x1a   : > { %p1268_p0 = pnand %p732_p11, %p133_p13  ;;  %s145_s7 = sshll.u32 %s1146_s6, 4  ;;  %s146_s7 = int_to_ptr.vmem [resolvable:$true] %s145_s7 }
  0x1b   : > { %1492 = sst [smem:[#allocation15_spill]] %s1491_s4  ;;  %p814_p2 = scmp.lt.s32.totalorder %s1144_s22, 16 }
  0x1c   : > { %s1493_s5 = scalar_select %p1268_p0, 1, 0 }
  0x1d   : > { %p801_p1 = pneg %p1268_p0  ;;  %p1283_p7 = pnand %p814_p2, %p1244_p4 }
  0x1e   : > { %s977_s10 = scalar_lea.vmem %s146_s7, 128  ;;  %p985_p12 = scmp.lt.s32.totalorder %s146_s7, %s146_s7 }
  0x1f   : > { %p1277_p5 = pnand %p801_p1, %p1239_p3  ;;  %p978_p9 = scmp.ne.s32.totalorder %s146_s7, %s977_s10 }
  0x20   : > { %p986_p10 = scmp.lt.s32.totalorder %s977_s10, %s977_s10 }
  0x21   : > { %p968_p8 = pneg %p1277_p5 }
  0x22   : > { %p987_p6 = por %p986_p10, %p985_p12 }
  0x23   : > { %p980_p11 = pnand %p978_p9, %p968_p8 }
  0x25   : > { %p981_p13 = pneg %p980_p11 }
  0x27   : > { %p988_p0 = pnand %p987_p6, %p981_p13 }
  0x29   : > { %991 = shalt.err (!%p988_p0)
}
  0x2a   : > { %s1147_s11 = smov 64   ;;  %s1148_s15 = smov 4  }
  0x2b   : > { %s1496_s0 = sld [smem:[#allocation17_spill]]  ;;  %s29_s28 = sadd.s32 1, %s1136_s20 }
  0x2c   : > { %s32_s6 = sadd.s32 1, %s1140_s21  ;;  %p30_p4 = scmp.ge.s32.totalorder %s29_s28, 8 }
  0x2d   : > { %s162_s10 = sand.u32 1, %s1124_s17   ;;  %s736_s8 = sshll.u32 %s1140_s21, 2 }
  0x2e   : > { %s735_s25 = sshll.u32 %s162_s10, 8  ;;  %s1520_s28 = smov (%p30_p4, %s29_s28), 0 }
  0x2f   : > { %1497 = sst [smem:[#allocation16_spill]] %s1520_s28  ;;  %s1522_s6 = smov (!%p30_p4, %s32_s6), %s1140_s21 }
  0x30   : > { %s57_s27 = ssub.s32 %s1136_s20, %s1520_s28  ;;  %p34_p6 = scmp.ge.s32.totalorder %s1522_s6, 2 }
  0x31   : > { %804 = dma.hbm_to_vmem [thread:$0]  (!%p1277_p5), %s1496_s0, 128, %s146_s7, [#allocation4], %s1147_s11, %s1147_s11, %s1148_s15  }
  0x32   : > { %s737_s23 = sshll.u32 %s1136_s20, 7  ;;  %s166_s7 = scalar_lea.vmem [#allocation6], %s735_s25 }
  0x33   : > { %s175_s11 = sshll.u32 %s166_s7, 4  ;;  %s1524_s6 = smov (%p34_p6, %s1522_s6), 0  ;;  %s1306_s11 = int_to_ptr.vmem [resolvable:$true] %s175_s11 }
  0x34   : > { %s172_s15 = sadd.s32 %s737_s23, %s736_s8  ;;  %s58_s24 = ssub.s32 %s1140_s21, %s1524_s6 }
  0x35   : > { %s738_s0 = sshll.u32 %s172_s15, 6  ;;  %s59_s4 = sor.u32 %s58_s24, %s57_s27 }
  0x36   : > { %p107_p10 = scmp.eq.s32.totalorder %s58_s24, 0  ;;  %p60_p12 = scmp.eq.s32.totalorder %s59_s4, 0 }
  0x37   : > { %s174_s20 = scalar_lea.hbm %s1469_s1, %s738_s0  ;;  %s1498_s25 = sadd.s32 1, %s1112_s14 }
  0x38   : > { %s1316_s7 = scalar_select %p107_p10, %s1112_s14, %s1498_s25  }
  0x39   : > { %s1499_s22 = sadd.s32 1, %s1124_s17  ;;  %s163_s8 = scalar_lea.sflag [#allocation7], %s162_s10 }
  0x3a   : > { %s1321_s3 = scalar_select %p60_p12, %s1124_s17, %s1499_s22  }
  0x3b   : > { %p994_p0 = pneg %p1283_p7  ;;  %s1005_s23 = scalar_lea.vmem %s1306_s11, 4096 }
  0x3c   : > { %p1006_p1 = scmp.ne.s32.totalorder %s1306_s11, %s1005_s23  ;;  %s1149_s27 = smov [#allocation6]  }
  0x3d   : > { %s1010_s15 = sshll.u32 %s1149_s27, 4  ;;  %s1011_s15 = int_to_ptr.vmem [resolvable:$false] %s1010_s15 }
  0x3e   : > { %p1008_p2 = pnand %p1006_p1, %p994_p0  ;;  %s1012_s4 = scalar_lea.vmem %s1011_s15, 8192 }
  0x3f   : > { %p1013_p8 = scmp.lt.s32.totalorder %s1306_s11, %s1011_s15  ;;  %p1014_p9 = scmp.lt.s32.totalorder %s1012_s4, %s1005_s23 }
  0x40   : > { %p1009_p5 = pneg %p1008_p2 }
  0x41   : > { %p1015_p11 = por %p1014_p9, %p1013_p8 }
  0x43   : > { %p1016_p13 = pnand %p1015_p11, %p1009_p5 }
  0x45   : > { %1019 = shalt.err (!%p1016_p13)
}
  0x46   : > { %s1150_s0 = smov 512   ;;  %s1151_s12 = smov 256  }
  0x47   : > { %s1152_s22 = smov 16   ;;  %p1500_p4 = scmp.ne.s32.totalorder %s1493_s5, 0 }
  0x48   : > { %808 = dma.hbm_to_vmem [thread:$0]  (!%p1283_p7), %s174_s20, 4096, %s1306_s11, %s163_s8, %s1150_s0, %s1151_s12, %s1152_s22  }
  0x49   : > { %187 = sbr.rel (%p1500_p4) target bundleno = 507 (0x1fb), region = 32 }
  0x4e   : > { %1091 = dma.done.wait (%p1239_p3), [#allocation4], 128  }
  0x4f   : > { %1093 = vsyncadd (%p1239_p3), [#allocation4], 4294967168  ;;  %s193_s28 = sand.u32 1, %s1120_s16   ;;  %p1501_p6 = scmp.ne.s32.totalorder %s1489_s29, 0 }
  0x50   : > { %s741_s10 = sshll.u32 %s193_s28, 8  ;;  %s194_s24 = scalar_lea.sflag [#allocation7], %s193_s28 }
  0x51   : > { %s1338_s25 = scalar_lea.vmem [#allocation6], %s741_s10 }
  0x52   : > { %1095 = dma.done.wait (%p1501_p6), %s194_s24, 4096  }
  0x53   : > { %1097 = vsyncadd (%p1501_p6), %s194_s24, 4294963200  ;;  %s217_s20 = sand.u32 1, %s1108_s13   ;;  %v1153_v0 = vmov 0   ;;  %v916_v1 = vld [vmem:[%s1338_s25 + $0xe4] ss:$16 sps:$4 sm:$0xff]   ;;  %v964_v33 = vld [vmem:[#allocation3] sm:$0xff]  }
  0x54   : > { %s1347_s26 = sshll.u32 %s217_s20, 5  ;;  %455 = vmatprep.mubr.bf16.mxu0 %v1153_v0  ;;  %498 = vmatprep.mubr.bf16.mxu1 %v1153_v0  ;;  %v918_v2 = vld [vmem:[%s1338_s25 + $0xec] ss:$16 sps:$4 sm:$0xff]   ;;  %v920_v3 = vld [vmem:[%s1338_s25 + $0xe0] ss:$16 sps:$4 sm:$0xff]   ;;  %p776_p3 = scmp.ne.s32.totalorder %s1128_s18, 0 }
  0x55   : > { %423 = vmatprep.subr.bf16.mxu0 %v916_v1  ;;  %v921_v4 = vld [vmem:[%s1338_s25 + $0xe8] ss:$16 sps:$4 sm:$0xff]   ;;  %466 = vmatprep.subr.bf16.mxu1 %v918_v2  ;;  %v922_v5 = vld [vmem:[%s1338_s25 + $0xc4] ss:$16 sps:$4 sm:$0xff]   ;;  %v924_v6 = vld [vmem:[%s1338_s25 + $0xcc] ss:$16 sps:$4 sm:$0xff]  }
  0x56   : > { %424 = vmatpush1.bf16.msra.mxu0 %v920_v3  ;;  %467 = vmatpush1.bf16.msra.mxu1 %v921_v4  ;;  %v926_v7 = vld [vmem:[%s1338_s25 + $0xc0] ss:$16 sps:$4 sm:$0xff]   ;;  %v927_v8 = vld [vmem:[%s1338_s25 + $0xc8] ss:$16 sps:$4 sm:$0xff]   ;;  %v928_v9 = vld [vmem:[%s1338_s25 + $0xa4] ss:$16 sps:$4 sm:$0xff]  }
  0x57   : > { %425 = vmatprep.subr.bf16.mxu0 %v922_v5  ;;  %468 = vmatprep.subr.bf16.mxu1 %v924_v6  ;;  %v930_v10 = vld [vmem:[%s1338_s25 + $0xac] ss:$16 sps:$4 sm:$0xff]   ;;  %v932_v11 = vld [vmem:[%s1338_s25 + $0xa0] ss:$16 sps:$4 sm:$0xff]   ;;  %v933_v12 = vld [vmem:[%s1338_s25 + $0xa8] ss:$16 sps:$4 sm:$0xff]  }
  0x58   : > { %v934_v13 = vld [vmem:[%s1338_s25 + $0x84] ss:$16 sps:$4 sm:$0xff]   ;;  %v936_v14 = vld [vmem:[%s1338_s25 + $0x8c] ss:$16 sps:$4 sm:$0xff]   ;;  %v938_v15 = vld [vmem:[%s1338_s25 + $0x80] ss:$16 sps:$4 sm:$0xff]  }
  0x59   : > { %v939_v16 = vld [vmem:[%s1338_s25 + $0x88] ss:$16 sps:$4 sm:$0xff]   ;;  %v940_v17 = vld [vmem:[%s1338_s25 + $0x64] ss:$16 sps:$4 sm:$0xff]   ;;  %v942_v18 = vld [vmem:[%s1338_s25 + $0x6c] ss:$16 sps:$4 sm:$0xff]  }
  0x5a   : > { %426 = vmatpush1.bf16.msra.mxu0 %v926_v7  ;;  %469 = vmatpush1.bf16.msra.mxu1 %v927_v8  ;;  %v944_v19 = vld [vmem:[%s1338_s25 + $0x60] ss:$16 sps:$4 sm:$0xff]   ;;  %v945_v20 = vld [vmem:[%s1338_s25 + $0x68] ss:$16 sps:$4 sm:$0xff]   ;;  %v946_v21 = vld [vmem:[%s1338_s25 + $0x44] ss:$16 sps:$4 sm:$0xff]  }
  0x5b   : > { %427 = vmatprep.subr.bf16.mxu0 %v928_v9  ;;  %470 = vmatprep.subr.bf16.mxu1 %v930_v10  ;;  %v948_v22 = vld [vmem:[%s1338_s25 + $0x4c] ss:$16 sps:$4 sm:$0xff]   ;;  %v950_v23 = vld [vmem:[%s1338_s25 + $0x40] ss:$16 sps:$4 sm:$0xff]   ;;  %v951_v24 = vld [vmem:[%s1338_s25 + $0x48] ss:$16 sps:$4 sm:$0xff]  }
  0x5c   : > { %v952_v25 = vld [vmem:[%s1338_s25 + $0x24] ss:$16 sps:$4 sm:$0xff]   ;;  %v954_v26 = vld [vmem:[%s1338_s25 + $0x2c] ss:$16 sps:$4 sm:$0xff]   ;;  %v956_v27 = vld [vmem:[%s1338_s25 + $0x20] ss:$16 sps:$4 sm:$0xff]  }
  0x5d   : > { %v957_v28 = vld [vmem:[%s1338_s25 + $0x28] ss:$16 sps:$4 sm:$0xff]   ;;  %v958_v29 = vld [vmem:[%s1338_s25 + $0x4] ss:$16 sps:$4 sm:$0xff]   ;;  %v960_v30 = vld [vmem:[%s1338_s25 + $0xc] ss:$16 sps:$4 sm:$0xff]  }
  0x5e   : > { %428 = vmatpush1.bf16.msra.mxu0 %v932_v11  ;;  %471 = vmatpush1.bf16.msra.mxu1 %v933_v12  ;;  %v962_v31 = vld [vmem:[%s1338_s25] ss:$16 sps:$4 sm:$0xff]   ;;  %v963_v32 = vld [vmem:[%s1338_s25 + $0x8] ss:$16 sps:$4 sm:$0xff]   ;;  %s1382_s29 = scalar_lea.vmem [#allocation8], %s1347_s26 }
  0x5f   : > { %429 = vmatprep.subr.bf16.mxu0 %v934_v13  ;;  %472 = vmatprep.subr.bf16.mxu1 %v936_v14 }
  0x62   : > { %430 = vmatpush1.bf16.msra.mxu0 %v938_v15  ;;  %473 = vmatpush1.bf16.msra.mxu1 %v939_v16 }
  0x63   : > { %431 = vmatprep.subr.bf16.mxu0 %v940_v17  ;;  %474 = vmatprep.subr.bf16.mxu1 %v942_v18 }
  0x66   : > { %432 = vmatpush1.bf16.msra.mxu0 %v944_v19  ;;  %475 = vmatpush1.bf16.msra.mxu1 %v945_v20 }
  0x67   : > { %433 = vmatprep.subr.bf16.mxu0 %v946_v21  ;;  %476 = vmatprep.subr.bf16.mxu1 %v948_v22 }
  0x6a   : > { %434 = vmatpush1.bf16.msra.mxu0 %v950_v23  ;;  %477 = vmatpush1.bf16.msra.mxu1 %v951_v24 }
  0x6b   : > { %435 = vmatprep.subr.bf16.mxu0 %v952_v25  ;;  %478 = vmatprep.subr.bf16.mxu1 %v954_v26 }
  0x6e   : > { %436 = vmatpush1.bf16.msra.mxu0 %v956_v27  ;;  %479 = vmatpush1.bf16.msra.mxu1 %v957_v28 }
  0x6f   : > { %437 = vmatprep.subr.bf16.mxu0 %v958_v29  ;;  %480 = vmatprep.subr.bf16.mxu1 %v960_v30 }
  0x72   : > { %438 = vmatpush1.bf16.msra.mxu0 %v962_v31  ;;  %481 = vmatpush1.bf16.msra.mxu1 %v963_v32 }
  0x75   : > { %456 = vmatmul.mubr.bf16.vlgmr.msra.gmra.mxu0 %v964_v33  ;;  %499 = vmatmul.mubr.bf16.vlgmr.msra.gmra.mxu1 %v964_v33 }
 0x135   : > { %v457_v34 = vpop.f32.mrf.mxu0  ;;  %v500_v35 = vpop.f32.mrf.mxu1 }
 0x137   : > { %v459_v36 = vpop.f32.mrf.mxu0  ;;  %v502_v37 = vpop.f32.mrf.mxu1  ;;  %512 = sbr.rel (%p776_p3) target bundleno = 320 (0x140), region = 44 }
 0x139   : > { %v461_v38 = vpop.f32.mrf.mxu0  ;;  %v504_v39 = vpop.f32.mrf.mxu1 }
 0x13b   : > { %v463_v40 = vpop.f32.mrf.mxu0  ;;  %v506_v41 = vpop.f32.mrf.mxu1 }
 0x13c   : > { %513 = vst [vmem:[#allocation2 + $0x30] sm:$0xff] %v457_v34  ;;  %514 = vst [vmem:[#allocation2] sm:$0xff] %v459_v36 }
 0x13d   : > { %515 = vst [vmem:[#allocation2 + $0x18] sm:$0xff] %v500_v35  ;;  %516 = vst [vmem:[#allocation2 + $0x10] sm:$0xff] %v502_v37 }
 0x13e   : > { %517 = vst [vmem:[#allocation2 + $0x8] sm:$0xff] %v461_v38  ;;  %518 = vst [vmem:[#allocation2 + $0x20] sm:$0xff] %v463_v40 }
 0x13f   : > { %519 = vst [vmem:[#allocation2 + $0x28] sm:$0xff] %v504_v39  ;;  %520 = vst [vmem:[#allocation2 + $0x38] sm:$0xff] %v506_v41 }
 0x140 PF: > { %p777_p7 = scmp.le.s32.totalorder %s1128_s18, 0 }
 0x142   : > { %524 = sbr.rel (%p777_p7) target bundleno = 334 (0x14e), region = 48 }
 0x147   : > { %v525_v42 = vld [vmem:[#allocation2 + $0x30] sm:$0xff]  ;;  %v526_v43 = vld [vmem:[#allocation2] sm:$0xff]  ;;  %v527_v44 = vld [vmem:[#allocation2 + $0x18] sm:$0xff] }
 0x148   : > { %v533_v45 = vmax.f32 %v525_v42, %v457_v34  ;;  %v534_v46 = vmax.f32 %v526_v43, %v459_v36  ;;  %v535_v47 = vmax.f32 %v527_v44, %v500_v35  ;;  %v528_v48 = vld [vmem:[#allocation2 + $0x10] sm:$0xff]  ;;  %v529_v49 = vld [vmem:[#allocation2 + $0x8] sm:$0xff]  ;;  %v530_v50 = vld [vmem:[#allocation2 + $0x20] sm:$0xff] }
 0x149   : > { %v536_v51 = vmax.f32 %v528_v48, %v502_v37  ;;  %v537_v52 = vmax.f32 %v529_v49, %v461_v38  ;;  %v538_v53 = vmax.f32 %v530_v50, %v463_v40  ;;  %v531_v54 = vld [vmem:[#allocation2 + $0x28] sm:$0xff]  ;;  %v532_v55 = vld [vmem:[#allocation2 + $0x38] sm:$0xff] }
 0x14a   : > { %541 = vst [vmem:[#allocation2 + $0x30] sm:$0xff] %v533_v45  ;;  %542 = vst [vmem:[#allocation2] sm:$0xff] %v534_v46  ;;  %v539_v56 = vmax.f32 %v531_v54, %v504_v39  ;;  %v540_v57 = vmax.f32 %v532_v55, %v506_v41 }
 0x14b   : > { %543 = vst [vmem:[#allocation2 + $0x18] sm:$0xff] %v535_v47  ;;  %544 = vst [vmem:[#allocation2 + $0x10] sm:$0xff] %v536_v51 }
 0x14c   : > { %545 = vst [vmem:[#allocation2 + $0x8] sm:$0xff] %v537_v52  ;;  %546 = vst [vmem:[#allocation2 + $0x20] sm:$0xff] %v538_v53 }
 0x14d   : > { %547 = vst [vmem:[#allocation2 + $0x28] sm:$0xff] %v539_v56  ;;  %548 = vst [vmem:[#allocation2 + $0x38] sm:$0xff] %v540_v57 }
 0x14e PF: > { %p778_p10 = scmp.ne.s32.totalorder %s1128_s18, 7 }
 0x150   : > { %552 = sbr.rel (%p778_p10) target bundleno = 479 (0x1df), region = 52 }
 0x155   : > { %v561_v58 = vld [vmem:[%s1470_s2] sm:$0xff]  ;;  %v1154_v59 = vmov 0   ;;  %v562_v60 = vld [vmem:[%s1470_s2 + $0x8] sm:$0xff]  ;;  %v553_v61 = vld [vmem:[#allocation2 + $0x30] sm:$0xff] }
 0x156   : > { %965 = vset.pattern.permute.xlu0 %v1154_v59  ;;  %v554_v62 = vld [vmem:[#allocation2] sm:$0xff]  ;;  %v555_v63 = vld [vmem:[#allocation2 + $0x18] sm:$0xff]  ;;  %v556_v0 = vld [vmem:[#allocation2 + $0x10] sm:$0xff] }
 0x157   : > { %565 = vperm.xlu0 %965, %v561_v58   ;;  %v557_v6 = vld [vmem:[#allocation2 + $0x8] sm:$0xff]  ;;  %v558_v7 = vld [vmem:[#allocation2 + $0x20] sm:$0xff]  ;;  %v560_v13 = vld [vmem:[#allocation2 + $0x38] sm:$0xff] }
 0x158   : > { %v559_v12 = vld [vmem:[#allocation2 + $0x28] sm:$0xff] }
 0x15b   : > { %570 = vperm.xlu0 %965, %v562_v60  }
 0x1d2   : > { %v566_v1 = vpop.permute.xlu0 %565 }
 0x1d3   : > { %v573_v2 = vadd.f32 %v566_v1, %v553_v61  ;;  %v574_v3 = vadd.f32 %v566_v1, %v554_v62  ;;  %v575_v4 = vadd.f32 %v566_v1, %v555_v63  ;;  %v576_v5 = vadd.f32 %v566_v1, %v556_v0 }
 0x1d5   : > { %v581_v8 = vmax.f32 %v573_v2, 0.0  ;;  %v582_v9 = vmax.f32 %v574_v3, 0.0  ;;  %v583_v10 = vmax.f32 %v575_v4, 0.0  ;;  %v584_v11 = vmax.f32 %v576_v5, 0.0 }
 0x1d6   : > { %v571_v14 = vpop.permute.xlu0 %570 }
 0x1d7   : > { %v788_v15 = vpack.c.bf16 %v582_v9, %v581_v8  ;;  %v789_v16 = vpack.c.bf16 %v584_v11, %v583_v10  ;;  %v577_v17 = vadd.f32 %v571_v14, %v557_v6  ;;  %v578_v18 = vadd.f32 %v571_v14, %v558_v7 }
 0x1d8   : > { %v579_v19 = vadd.f32 %v571_v14, %v559_v12  ;;  %v580_v20 = vadd.f32 %v571_v14, %v560_v13 }
 0x1d9   : > { %613 = vst [vmem:[%s1382_s29] sm:$0xff] %v788_v15  ;;  %614 = vst [vmem:[%s1382_s29 + $0x8] sm:$0xff] %v789_v16  ;;  %v585_v21 = vmax.f32 %v577_v17, 0.0  ;;  %v586_v22 = vmax.f32 %v578_v18, 0.0 }
 0x1da   : > { %v587_v23 = vmax.f32 %v579_v19, 0.0  ;;  %v588_v24 = vmax.f32 %v580_v20, 0.0 }
 0x1db   : > { %v790_v25 = vpack.c.bf16 %v586_v22, %v585_v21 }
 0x1dc   : > { %v791_v26 = vpack.c.bf16 %v588_v24, %v587_v23 }
 0x1dd   : > { %615 = vst [vmem:[%s1382_s29 + $0x10] sm:$0xff] %v790_v25 }
 0x1de   : > { %616 = vst [vmem:[%s1382_s29 + $0x18] sm:$0xff] %v791_v26 }
 0x1df PF: > { %s792_s18 = sshll.u32 %s1132_s19, 8  ;;  %s1502_s15 = sld [smem:[#allocation18_spill]] }
 0x1e0   : > { %s631_s12 = sshll.u32 %s1382_s29, 4  ;;  %s1408_s22 = scalar_lea.sflag [#allocation5], %s217_s20  ;;  %s1404_s12 = int_to_ptr.vmem [resolvable:$true] %s631_s12 }
 0x1e1   : > { %s1020_s28 = scalar_lea.vmem %s1404_s12, 512  ;;  %p1504_p0 = scmp.ne.s32.totalorder %s1490_s30, 0 }
 0x1e2   : > { %p1021_p12 = scmp.ne.s32.totalorder %s1404_s12, %s1020_s28  ;;  %s1155_s19 = smov [#allocation8]  }
 0x1e3   : > { %s1024_s10 = sshll.u32 %s1155_s19, 4  ;;  %s1025_s10 = int_to_ptr.vmem [resolvable:$false] %s1024_s10 }
 0x1e4   : > { %p1022_p1 = pnand %p1021_p12, %p1504_p0  ;;  %s1026_s24 = scalar_lea.vmem %s1025_s10, 1024 }
 0x1e5   : > { %s1503_s4 = smov %s1502_s15  ;;  %s1401_s0 = scalar_lea.hbm %s1502_s15, %s792_s18 }
 0x1e6   : > { %p1023_p2 = pneg %p1022_p1  ;;  %p1027_p5 = scmp.lt.s32.totalorder %s1404_s12, %s1025_s10 }
 0x1e7   : > { %p1028_p8 = scmp.lt.s32.totalorder %s1026_s24, %s1020_s28 }
 0x1e9   : > { %p1029_p9 = por %p1028_p8, %p1027_p5 }
 0x1eb   : > { %p1030_p11 = pnand %p1029_p9, %p1023_p2 }
 0x1ed   : > { %1033 = shalt.err (!%p1030_p11)
}
 0x1ee   : > { %s1034_s25 = scalar_lea.hbm %s1401_s0, 512  ;;  %s1038_s29 = scalar_lea.hbm %s1503_s4, 1024 }
 0x1ef   : > { %p1035_p13 = scmp.ne.s32.totalorder %s1401_s0, %s1034_s25  ;;  %p1039_p3 = scmp.lt.s32.totalorder %s1401_s0, %s1503_s4 }
 0x1f0   : > { %p1040_p7 = scmp.lt.s32.totalorder %s1038_s29, %s1034_s25 }
 0x1f1   : > { %p1036_p4 = pnand %p1035_p13, %p1504_p0 }
 0x1f2   : > { %p1041_p10 = por %p1040_p7, %p1039_p3 }
 0x1f3   : > { %p1037_p6 = pneg %p1036_p4 }
 0x1f5   : > { %p1042_p12 = pnand %p1041_p10, %p1037_p6 }
 0x1f7   : > { %1045 = shalt.err (!%p1042_p12)
}
 0x1f8   : > { %s1156_s11 = smov 256   ;;  %s1157_s8 = smov 512  }
 0x1f9   : > { %s1158_s18 = smov 16  }
 0x1fa   : > { %799 = dma.vmem_to_hbm [thread:$0]  (%p1504_p0), %s1404_s12, 512, %s1401_s0, %s1408_s22, %s1156_s11, %s1157_s8, %s1158_s18  }
 0x1fb PF: > { %s1505_s23 = sld [smem:[#allocation14_spill]] }
 0x1fc   : > { %s1506_s27 = sld [smem:[#allocation12_spill]] }
 0x1fd   : > { %s1507_s15 = sld [smem:[#allocation15_spill]] }
 0x201   : > { %p816_p1 = scmp.ge.s32.totalorder %s1505_s23, 2 }
 0x202   : > { %s646_s28 = sand.u32 1, %s1506_s27  }
 0x203   : > { %p1508_p2 = scmp.ne.s32.totalorder %s1507_s15, 0  ;;  %s647_s19 = scalar_lea.sflag [#allocation5], %s646_s28 }
 0x205   : > { %p810_p5 = pnand %p816_p1, %p1508_p2 }
 0x207   : > { %p811_p8 = pneg %p810_p5 }
 0x209   : > { %1099 = dma.done.wait (%p811_p8), %s647_s19, 512  }
 0x20a   : > { %1101 = vsyncadd (%p811_p8), %s647_s19, 4294966784  ;;  %s20_s22 = sadd.s32 1, %s1505_s23   ;;  %s1509_s18 = sld [smem:[#allocation13_spill]] }
 0x20b   : > { %p17_p9 = scmp.ge.s32.totalorder %s20_s22, 18   ;;  %s1510_s20 = sld [smem:[#allocation16_spill]] }
 0x20c   : > { %s1511_s12 = smov %s1108_s13  ;;  %s1512_s13 = smov %s1112_s14 }
 0x20d   : > { %s1513_s14 = smov %s1316_s7  ;;  %s1514_s15 = smov %s1120_s16 }
 0x20e   : > { %s1515_s16 = smov %s1124_s17  ;;  %s1516_s17 = smov %s1321_s3 }
 0x20f   : > { %s1517_s19 = smov %s1140_s21  ;;  %s1518_s21 = smov %s1524_s6 }
 0x210   :  { %19 = sbr.rel (!%p17_p9) target bundleno = 13 (0xd), region = 94 }
 0x215   :  { %652 = vsyncpa [#allocation4], 1 }
 0x216   :  { %654 = vsyncpa [#allocation4 + $0x1], 1 }
 0x217   :  { %655 = vsyncpa [#allocation7], 1 }
 0x218   :  { %657 = vsyncpa [#allocation7 + $0x1], 1 }
 0x219   :  { %658 = vsyncpa [#allocation5], 1 }
 0x21a   :  { %660 = vsyncpa [#allocation5 + $0x1], 1 }

</bundles_post_ra>
